<compile_context>
chip_gen: v5e
topology: v5e:2x2
jax: 0.10.0
libtpu: 0.0.40
codegen_flags: <defaults>
</compile_context>

<pallas_src>
import jax
import jax.numpy as jnp
from jax.experimental import pallas as pl
from jax.experimental.pallas import tpu as pltpu


class LambdaLayer:
    """Minimal functional equivalent of the PyTorch LambdaLayer module."""

    def __init__(self, m_lambda):
        self.m_lambda = m_lambda

    def __call__(self, x):
        return self.m_lambda(x)


def _round_up(a: int, b: int) -> int:
    return (a + b - 1) // b * b


def _sum_h_kernel(x_ref, o_ref):
    # x_ref block: (tile_r, H, W)   o_ref block: (tile_r, W)
    # Reduce over the sublane (H) axis on-chip; accumulate in f32 so bf16/fp16
    # inputs don't lose precision over large H (no-op cast for f32 inputs).
    x = x_ref[...].astype(jnp.float32)
    o_ref[...] = jnp.sum(x, axis=1).astype(o_ref.dtype)


def reduce_sum_dim2(x: jax.Array) -> jax.Array:
    """Pallas equivalent of LambdaLayer(lambda t: torch.sum(t, dim=2))."""
    N, C, H, W = x.shape
    R = N * C
    x2 = x.reshape(R, H, W)  # free view: fuse (N, C) into one tiled row axis

    itemsize = x.dtype.itemsize
    # VMEM footprint of one (H, W) row after (sublane, lane) tile padding.
    sublane_pack = 8 * max(1, 4 // itemsize)
    row_bytes = _round_up(H, sublane_pack) * _round_up(W, 128) * itemsize

    # ~6 MiB per input buffer (double-buffered -> ~12 MiB + small output
    # buffers), comfortably inside the 32 MiB limit we request below, which is
    # itself safe on v7x (64 MiB physical VMEM) as well as v5e/v6e.
    in_budget = 6 * 1024 * 1024
    rows_fit = max(1, in_budget // row_bytes)
    if rows_fit >= R:
        tile_r = R
        # Give v7x's two TensorCores at least two parallel grid steps when the
        # split keeps the output tile's sublane dim a multiple of 8.
        half = _round_up(pl.cdiv(R, 2), 8)
        if half < R:
            tile_r = half
    else:
        tile_r = max(8, (rows_fit // 8) * 8)

    grid = (pl.cdiv(R, tile_r),)

    out2 = pl.pallas_call(
        _sum_h_kernel,
        out_shape=jax.ShapeDtypeStruct((R, W), x.dtype),
        grid_spec=pltpu.PrefetchScalarGridSpec(
            num_scalar_prefetch=0,
            grid=grid,
            # Last two dims of each block equal the full array dims, so the
            # (8,128) divisibility rule is satisfied for any H, W.
            in_specs=[pl.BlockSpec((tile_r, H, W), lambda r: (r, 0, 0))],
            out_specs=pl.BlockSpec((tile_r, W), lambda r: (r, 0)),
        ),
        compiler_params=pltpu.CompilerParams(
            dimension_semantics=("parallel",),
            vmem_limit_bytes=32 * 1024 * 1024,
        ),
        cost_estimate=pl.CostEstimate(
            flops=int(R * H * W),
            transcendentals=0,
            bytes_accessed=int((R * H * W + R * W) * itemsize),
        ),
    )(x2)
    return out2.reshape(N, C, W)


if __name__ == "__main__":
    key = jax.random.PRNGKey(0)
    # Small NCHW input consistent with a conv-style feature map.
    x = jax.random.normal(key, (2, 4, 16, 16), dtype=jnp.float32)

    layer = LambdaLayer(reduce_sum_dim2)
    out = jax.block_until_ready(layer(x))

    ref = jnp.sum(x, axis=2)  # torch.sum(x, dim=2) semantics
    assert out.shape == ref.shape == (2, 4, 16)
    assert jnp.allclose(out, ref, atol=1e-5, rtol=1e-5)

    # Extra check that exercises the multi-step "parallel" grid path.
    x_big = jax.random.normal(jax.random.PRNGKey(1), (2, 64, 16, 16),
                              dtype=jnp.float32)
    out_big = jax.block_until_ready(reduce_sum_dim2(x_big))
    assert jnp.allclose(out_big, jnp.sum(x_big, axis=2), atol=1e-5, rtol=1e-5)

    print("KERNEL_OK")
</pallas_src>

<mosaic_0001>
module attributes {stable_mosaic.version = 11 : i64} {
  func.func @_sum_h_kernel(%arg0: i32, %arg1: memref<8x16x16xf32, #tpu.memory_space<vmem>>, %arg2: memref<8x16xf32, #tpu.memory_space<vmem>>) attributes {dimension_semantics = [#tpu.dimension_semantics<parallel>], iteration_bounds = array<i64: 1>, scalar_prefetch = 0 : i64, scratch_operands = 0 : i64, tpu.core_type = #tpu.core_type<tc>, window_params = [{transform_indices = @transform_0, window_bounds = array<i64: 8, 16, 16>}, {transform_indices = @transform_1, window_bounds = array<i64: 8, 16>}]} {
    %c0 = arith.constant 0 : index
    %c0_0 = arith.constant 0 : index
    %c0_1 = arith.constant 0 : index
    %0 = vector.load %arg1[%c0, %c0_0, %c0_1] : memref<8x16x16xf32, #tpu.memory_space<vmem>>, vector<8x16x16xf32>
    %cst = arith.constant dense<0.000000e+00> : vector<8x16xf32>
    %1 = vector.multi_reduction <add>, %0, %cst [1] : vector<8x16x16xf32> to vector<8x16xf32>
    %c0_2 = arith.constant 0 : index
    %c0_3 = arith.constant 0 : index
    %2 = vector.load %arg2[%c0_2, %c0_3] : memref<8x16xf32, #tpu.memory_space<vmem>>, vector<8x16xf32>
    tpu.vector_store %arg2[%c0_2, %c0_3], %1 {strides = array<i32>} : memref<8x16xf32, #tpu.memory_space<vmem>>, vector<8x16xf32>,
    return
  }
  func.func @transform_0(%arg0: i32) -> (i32, i32, i32) {
    %c0_i32 = arith.constant 0 : i32
    %c0_i32_0 = arith.constant 0 : i32
    %c0_i32_1 = arith.constant 0 : i32
    return %arg0, %c0_i32, %c0_i32_0 : i32, i32, i32
  }
  func.func @transform_1(%arg0: i32) -> (i32, i32) {
    %c0_i32 = arith.constant 0 : i32
    %c0_i32_0 = arith.constant 0 : i32
    return %arg0, %c0_i32 : i32, i32
  }
}

</mosaic_0001>

<bundles_post_ra>
// kernel: tpu_custom_call.1
= control target key start
LH: loop header
LB: loop body
LE: loop exit
PB: predicated region body
PF: predicated region fallthrough
CT: control target
= control target key end

     0   :  { %6 = vsyncpa [#allocation3], 0  ;;  %s250_s0 = inlined_call_operand.hbm [shape: f32[8,16,16], index: 0, kind: input, shape index: {}]   ;;  %s251_s1 = inlined_call_operand.hbm [shape: f32[8,16], index: 1, kind: output, shape index: {}]  }
   0x1   :  { %7 = vsyncpa [#allocation4], 0  ;;  %s12_s8 = sshll.u32 %s250_s0, 4  ;;  %s211_s9 = smov [#allocation2]   ;;  %s13_s8 = int_to_ptr.hbm [resolvable:$true] %s12_s8 }
   0x2   :  { %s14_s10 = sshll.u32 %s211_s9, 4  ;;  %s212_s11 = smov 128   ;;  %s15_s10 = int_to_ptr.vmem [resolvable:$true] %s14_s10 }
   0x3   :  { %s213_s12 = smov 8  }
   0x4   :  { %20 = dma.hbm_to_vmem [thread:$0]  %s13_s8, 2048, %s15_s10, [#allocation3], %s212_s11, %s212_s11, %s213_s12  }
   0x5   :  { %207 = dma.done.wait [#allocation3], 2048  }
   0x6   :  { %208 = vsyncadd [#allocation3], 4294965248  ;;  %vm41_vm0 = vcmask 130048   ;;  %v25_v0 = vld [vmem:[#allocation2] sm:$0xff]  ;;  %v26_v1 = vld [vmem:[#allocation2 + $0x8] sm:$0xff]  ;;  %vm122_vm1 = vcmask 1041409  }
   0x7   :  { %v27_v2 = vld [vmem:[#allocation2 + $0x10] sm:$0xff]  ;;  %v28_v3 = vld [vmem:[#allocation2 + $0x18] sm:$0xff]  ;;  %v29_v4 = vld [vmem:[#allocation2 + $0x20] sm:$0xff]  ;;  %v42_v6 = vsel %vm41_vm0, %v25_v0, 0.0  ;;  %v43_v7 = vsel %vm41_vm0, %v26_v1, 0.0  ;;  %vm124_vm2 = vcmask 1042434  }
   0x8   :  { %v30_v5 = vld [vmem:[#allocation2 + $0x28] sm:$0xff]  ;;  %v51_v8 = vsel %vm41_vm0, %v27_v2, 0.0  ;;  %v31_v9 = vld [vmem:[#allocation2 + $0x30] sm:$0xff]  ;;  %v32_v10 = vld [vmem:[#allocation2 + $0x38] sm:$0xff]  ;;  %v44_v12 = vadd.f32 %v43_v7, %v42_v6  ;;  %v52_v13 = vsel %vm41_vm0, %v28_v3, 0.0  ;;  %v60_v14 = vsel %vm41_vm0, %v29_v4, 0.0 }
   0x9   :  { %v33_v11 = vld [vmem:[#allocation2 + $0x40] sm:$0xff]  ;;  %v61_v15 = vsel %vm41_vm0, %v30_v5, 0.0  ;;  %v34_v16 = vld [vmem:[#allocation2 + $0x48] sm:$0xff]  ;;  %v35_v17 = vld [vmem:[#allocation2 + $0x50] sm:$0xff]  ;;  %v53_v19 = vadd.f32 %v52_v13, %v51_v8  ;;  %v69_v21 = vsel %vm41_vm0, %v31_v9, 0.0  ;;  %v70_v22 = vsel %vm41_vm0, %v32_v10, 0.0 }
   0xa   :  { %v36_v18 = vld [vmem:[#allocation2 + $0x58] sm:$0xff]  ;;  %v62_v20 = vadd.f32 %v61_v15, %v60_v14  ;;  %v37_v23 = vld [vmem:[#allocation2 + $0x60] sm:$0xff]  ;;  %v45_v24 = vrot.slane %v44_v12, 4  ;;  %v71_v25 = vadd.f32 %v70_v22, %v69_v21  ;;  %v78_v26 = vsel %vm41_vm0, %v33_v11, 0.0  ;;  %v38_v28 = vld [vmem:[#allocation2 + $0x68] sm:$0xff]  ;;  %s214_s0 = smov [#allocation5]  }
   0xb   :  { %v79_v27 = vsel %vm41_vm0, %v34_v16, 0.0  ;;  %v39_v29 = vld [vmem:[#allocation2 + $0x70] sm:$0xff]  ;;  %v54_v30 = vrot.slane %v53_v19, 4  ;;  %v87_v33 = vsel %vm41_vm0, %v35_v17, 0.0  ;;  %v88_v36 = vsel %vm41_vm0, %v36_v18, 0.0  ;;  %v40_v38 = vld [vmem:[#allocation2 + $0x78] sm:$0xff] }
   0xc   :  { %v63_v31 = vrot.slane %v62_v20, 4  ;;  %v80_v32 = vadd.f32 %v79_v27, %v78_v26  ;;  %v46_v34 = vadd.f32 %v45_v24, %v44_v12  ;;  %v72_v35 = vrot.slane %v71_v25, 4  ;;  %s143_s13 = sshll.u32 %s214_s0, 4  ;;  %s145_s16 = sshll.u32 %s251_s1, 4  ;;  %s144_s13 = int_to_ptr.vmem [resolvable:$true] %s143_s13  ;;  %s146_s16 = int_to_ptr.hbm [resolvable:$true] %s145_s16 }
   0xd   :  { %v96_v37 = vsel %vm41_vm0, %v37_v23, 0.0  ;;  %v55_v39 = vadd.f32 %v54_v30, %v53_v19  ;;  %v89_v42 = vadd.f32 %v88_v36, %v87_v33  ;;  %v97_v45 = vsel %vm41_vm0, %v38_v28, 0.0 }
   0xe   :  { %v64_v40 = vadd.f32 %v63_v31, %v62_v20  ;;  %v81_v41 = vrot.slane %v80_v32, 4  ;;  %v47_v43 = vrot.slane %v46_v34, 2  ;;  %v73_v44 = vadd.f32 %v72_v35, %v71_v25 }
   0xf   :  { %v105_v46 = vsel %vm41_vm0, %v39_v29, 0.0  ;;  %v56_v47 = vrot.slane %v55_v39, 2  ;;  %v90_v50 = vrot.slane %v89_v42, 4  ;;  %v98_v53 = vadd.f32 %v97_v45, %v96_v37 }
  0x10   :  { %v65_v48 = vrot.slane %v64_v40, 2  ;;  %v82_v49 = vadd.f32 %v81_v41, %v80_v32  ;;  %v48_v51 = vadd.f32 %v47_v43, %v46_v34  ;;  %v74_v52 = vrot.slane %v73_v44, 2 }
  0x11   :  { %v106_v54 = vsel %vm41_vm0, %v40_v38, 0.0  ;;  %v57_v55 = vadd.f32 %v56_v47, %v55_v39  ;;  %v91_v58 = vadd.f32 %v90_v50, %v89_v42  ;;  %v99_v61 = vrot.slane %v98_v53, 4 }
  0x12   :  { %v66_v56 = vadd.f32 %v65_v48, %v64_v40  ;;  %v83_v57 = vrot.slane %v82_v49, 2  ;;  %v49_v59 = vrot.slane %v48_v51, 1  ;;  %v75_v60 = vadd.f32 %v74_v52, %v73_v44 }
  0x13   :  { %v107_v62 = vadd.f32 %v106_v54, %v105_v46  ;;  %v58_v63 = vrot.slane %v57_v55, 1  ;;  %v92_v2 = vrot.slane %v91_v58, 2  ;;  %v100_v5 = vadd.f32 %v99_v61, %v98_v53 }
  0x14   :  { %v67_v0 = vrot.slane %v66_v56, 1  ;;  %v84_v1 = vadd.f32 %v83_v57, %v82_v49  ;;  %v50_v3 = vadd.f32 %v49_v59, %v48_v51  ;;  %v76_v4 = vrot.slane %v75_v60, 1 }
  0x15   :  { %v108_v6 = vrot.slane %v107_v62, 4  ;;  %v59_v7 = vadd.f32 %v58_v63, %v57_v55  ;;  %v93_v10 = vadd.f32 %v92_v2, %v91_v58  ;;  %v101_v12 = vrot.slane %v100_v5, 2 }
  0x16   :  { %v68_v8 = vadd.f32 %v67_v0, %v66_v56  ;;  %v85_v9 = vrot.slane %v84_v1, 1  ;;  %v77_v11 = vadd.f32 %v76_v4, %v75_v60  ;;  %vm126_vm3 = vcmask 1043459  }
  0x17   :  { %v109_v13 = vadd.f32 %v108_v6, %v107_v62  ;;  %v94_v15 = vrot.slane %v93_v10, 1  ;;  %v123_v16 = vsel %vm122_vm1, %v59_v7, %v50_v3  ;;  %vm128_vm4 = vcmask 1044484  }
  0x18   :  { %v86_v14 = vadd.f32 %v85_v9, %v84_v1  ;;  %v102_v17 = vadd.f32 %v101_v12, %v100_v5  ;;  %v125_v19 = vsel %vm124_vm2, %v68_v8, %v123_v16  ;;  %vm130_vm5 = vcmask 1045509  }
  0x19   :  { %v110_v18 = vrot.slane %v109_v13, 2  ;;  %v95_v20 = vadd.f32 %v94_v15, %v93_v10  ;;  %v127_v21 = vsel %vm126_vm3, %v77_v11, %v125_v19  ;;  %vm132_vm6 = vcmask 1046534  }
  0x1a   :  { %v103_v22 = vrot.slane %v102_v17, 1  ;;  %v129_v24 = vsel %vm128_vm4, %v86_v14, %v127_v21  ;;  %vm134_vm7 = vcmask 1047559  }
  0x1b   :  { %v111_v23 = vadd.f32 %v110_v18, %v109_v13  ;;  %v131_v25 = vsel %vm130_vm5, %v95_v20, %v129_v24 }
  0x1c   :  { %v104_v26 = vadd.f32 %v103_v22, %v102_v17 }
  0x1d   :  { %v112_v27 = vrot.slane %v111_v23, 1 }
  0x1e   :  { %v133_v29 = vsel %vm132_vm6, %v104_v26, %v131_v25 }
  0x1f   :  { %v113_v28 = vadd.f32 %v112_v27, %v111_v23 }
  0x21   :  { %v135_v30 = vsel %vm134_vm7, %v113_v28, %v133_v29 }
  0x22   :  { %137 = vst.msk [vmem:[#allocation5] sm:$0xff] %vm41_vm0, %v135_v30 }
  0x23   :  { %148 = dma.vmem_to_hbm [thread:$0]  %s144_s13, 128, %s146_s16, [#allocation4]  }
  0x24   :  { %209 = dma.done.wait [#allocation4], 128  }
  0x25   :  { %210 = vsyncadd [#allocation4], 4294967168 }
  0x26   :  { %153 = vsyncpa [#allocation3], 1 }
  0x27   :  { %154 = vsyncpa [#allocation4], 1 }

</bundles_post_ra>
